<compile_context>
chip_gen: v5e
topology: v5e:2x2
jax: 0.10.0
libtpu: 0.0.40
codegen_flags: <defaults>
</compile_context>

<pallas_src>
import jax
import jax.numpy as jnp
from jax import lax
from jax.experimental import pallas as pl
from jax.experimental.pallas import tpu as pltpu


def _round_up(x, m):
    return (x + m - 1) // m * m


def _choose_chunk(T, max_chunk=16):
    """Largest divisor of T that is <= max_chunk (keeps the grid exact)."""
    for c in range(min(T, max_chunk), 0, -1):
        if T % c == 0:
            return c
    return 1


# --------------------------------------------------------------------------
# Kernel: T_CHUNK GRU-RNN timesteps per grid iteration, weights VMEM-resident.
# --------------------------------------------------------------------------
def rnn_chunk_kernel(x_ref, h0_ref, w1_ref, b1_ref, wih_ref, bgx_ref,
                     whh_ref, bhn_ref, w2_ref, b2_ref,
                     q_ref, h_ref, gx_scr, hs_scr):
    """Shapes (P = padded):
      x_ref  : (TC, BP, DP)  f32   per-chunk input block
      h0_ref : (BP, HP)      f32   initial hidden (read only at chunk 0)
      w1_ref : (DP, HP)      bf16  fc1 weight,  b1_ref : (1, HP) f32
      wih_ref: (HP, 3*HP)    bf16  x-side GRU weight, cols [r | z | n]
      bgx_ref: (1, 3*HP)     f32   [b_ir+b_hr | b_iz+b_hz | b_in]
      whh_ref: (HP, 3*HP)    bf16  h-side GRU weight, cols [r | z | n]
      bhn_ref: (1, HP)       f32   b_hn
      w2_ref : (HP, AP)      bf16  fc2 weight,  b2_ref : (1, AP) f32
      q_ref  : (TC, BP, AP)  f32   per-chunk Q output block
      h_ref  : (BP, HP)      f32   hidden carry (VMEM-resident output block)
      gx_scr : (TC, BP, 3*HP) f32  scratch: hoisted x-side gate pre-activations
      hs_scr : (TC, BP, HP)   f32  scratch: per-step hidden states
    """
    TC, BP, DP = x_ref.shape
    HP = h0_ref.shape[-1]
    AP = w2_ref.shape[-1]

    c = pl.program_id(0)

    @pl.when(c == 0)
    def _():
        h_ref[...] = h0_ref[...]

    # ---- Hoisted, batched-over-time projections (M = TC*BP rows) ----
    x = x_ref[...].reshape(TC * BP, DP).astype(jnp.bfloat16)
    x1 = jnp.dot(x, w1_ref[...], preferred_element_type=jnp.float32) + b1_ref[...]
    x1 = jnp.maximum(x1, 0.0).astype(jnp.bfloat16)            # fc1 + ReLU
    gx = jnp.dot(x1, wih_ref[...], preferred_element_type=jnp.float32) + bgx_ref[...]
    gx_scr[...] = gx.reshape(TC, BP, 3 * HP)

    # ---- Sequential GRU recurrence: only h @ W_hh + gate math per step ----
    def step(t, h):
        gh = jnp.dot(h.astype(jnp.bfloat16), whh_ref[...],
                     preferred_element_type=jnp.float32)       # (BP, 3HP)
        g = gx_scr[t]                                          # (BP, 3HP)
        rz = jax.nn.sigmoid(g[:, :2 * HP] + gh[:, :2 * HP])    # one EUP pass
        r = rz[:, :HP]
        z = rz[:, HP:2 * HP]
        n = jnp.tanh(g[:, 2 * HP:] + r * (gh[:, 2 * HP:] + bhn_ref[...]))
        h_new = (1.0 - z) * n + z * h
        hs_scr[t] = h_new
        return h_new

    h_last = lax.fori_loop(0, TC, step, h_ref[...], unroll=True)
    h_ref[...] = h_last

    # ---- Deferred fc2: one batched matmul per chunk ----
    hs = hs_scr[...].reshape(TC * BP, HP).astype(jnp.bfloat16)
    q = jnp.dot(hs, w2_ref[...], preferred_element_type=jnp.float32) + b2_ref[...]
    q_ref[...] = q.reshape(TC, BP, AP)


# --------------------------------------------------------------------------
# Parameter packing: pad to lane/sublane boundaries, bf16 weights, f32 biases.
# --------------------------------------------------------------------------
def _pack_params(params):
    d_in, H = params["w1"].shape
    A = params["w2"].shape[1]
    DP = _round_up(d_in, 8)
    HP = _round_up(H, 128)
    AP = _round_up(A, 128)
    f32, bf16 = jnp.float32, jnp.bfloat16

    w1p = jnp.zeros((DP, HP), f32).at[:d_in, :H].set(params["w1"]).astype(bf16)
    b1p = jnp.zeros((1, HP), f32).at[:, :H].set(params["b1"])

    w_ih, w_hh = params["w_ih"], params["w_hh"]      # (H, 3H), gates [r, z, n]
    b_ih, b_hh = params["b_ih"], params["b_hh"]      # (1, 3H)

    def fuse_gate_cols(w):
        out = jnp.zeros((HP, 3 * HP), f32)
        for g in range(3):
            out = out.at[:H, g * HP:g * HP + H].set(w[:, g * H:(g + 1) * H])
        return out.astype(bf16)

    wihp = fuse_gate_cols(w_ih)
    whhp = fuse_gate_cols(w_hh)

    bgx = jnp.zeros((1, 3 * HP), f32)
    bgx = bgx.at[:, 0 * HP:0 * HP + H].set(b_ih[:, 0 * H:1 * H] + b_hh[:, 0 * H:1 * H])
    bgx = bgx.at[:, 1 * HP:1 * HP + H].set(b_ih[:, 1 * H:2 * H] + b_hh[:, 1 * H:2 * H])
    bgx = bgx.at[:, 2 * HP:2 * HP + H].set(b_ih[:, 2 * H:3 * H])
    bhn = jnp.zeros((1, HP), f32).at[:, :H].set(b_hh[:, 2 * H:3 * H])

    w2p = jnp.zeros((HP, AP), f32).at[:H, :A].set(params["w2"]).astype(bf16)
    b2p = jnp.zeros((1, AP), f32).at[:, :A].set(params["b2"])

    packed = dict(w1=w1p, b1=b1p, wih=wihp, bgx=bgx, whh=whhp, bhn=bhn,
                  w2=w2p, b2=b2p)
    return packed, (d_in, H, A, DP, HP, AP)


# --------------------------------------------------------------------------
# Wrappers
# --------------------------------------------------------------------------
def rnn_net_rollout(inputs_seq, hidden_state, params, max_chunk=16):
    """Run T RNNNet steps in ONE pallas_call (weights resident in VMEM).

    inputs_seq: (T, B, d_in); hidden_state: (..., H) -> flattened to (B, H).
    Returns (q_seq (T, B, n_actions), h_final (B, H)).
    """
    pp, (d_in, H, A, DP, HP, AP) = _pack_params(params)
    T, B, _ = inputs_seq.shape
    BP = _round_up(B, 8)
    TC = _choose_chunk(T, max_chunk)
    n_chunks = T // TC

    h0 = hidden_state.reshape(-1, H).astype(jnp.float32)
    # Only batch (-> mult of 8) and d_in (-> mult of 8) padding; no lane blowup.
    x_p = jnp.zeros((T, BP, DP), jnp.float32).at[:, :B, :d_in].set(inputs_seq)
    h0_p = jnp.zeros((BP, HP), jnp.float32).at[:B, :H].set(h0)

    const = lambda c: (0, 0)

    q_p, h_p = pl.pallas_call(
        rnn_chunk_kernel,
        out_shape=(
            jax.ShapeDtypeStruct((T, BP, AP), jnp.float32),
            jax.ShapeDtypeStruct((BP, HP), jnp.float32),
        ),
        grid_spec=pltpu.PrefetchScalarGridSpec(
            num_scalar_prefetch=0,
            grid=(n_chunks,),
            in_specs=[
                pl.BlockSpec((TC, BP, DP), lambda c: (c, 0, 0)),   # x chunk
                pl.BlockSpec((BP, HP), const),                     # h0
                pl.BlockSpec((DP, HP), const),                     # w1
                pl.BlockSpec((1, HP), const),                      # b1
                pl.BlockSpec((HP, 3 * HP), const),                 # w_ih fused
                pl.BlockSpec((1, 3 * HP), const),                  # bgx
                pl.BlockSpec((HP, 3 * HP), const),                 # w_hh fused
                pl.BlockSpec((1, HP), const),                      # b_hn
                pl.BlockSpec((HP, AP), const),                     # w2
                pl.BlockSpec((1, AP), const),                      # b2
            ],
            out_specs=(
                pl.BlockSpec((TC, BP, AP), lambda c: (c, 0, 0)),   # q chunk
                pl.BlockSpec((BP, HP), const),                     # h carry
            ),
            scratch_shapes=[
                pltpu.VMEM((TC, BP, 3 * HP), jnp.float32),         # gx
                pltpu.VMEM((TC, BP, HP), jnp.float32),             # h history
            ],
        ),
        input_output_aliases={1: 1},   # reuse padded-h0 HBM buffer for h_final
        compiler_params=pltpu.CompilerParams(
            dimension_semantics=("arbitrary",),    # chunk axis carries state
            vmem_limit_bytes=32 * 1024 * 1024,
        ),
    )(x_p, h0_p, pp["w1"], pp["b1"], pp["wih"], pp["bgx"],
      pp["whh"], pp["bhn"], pp["w2"], pp["b2"])

    return q_p[:, :B, :A], h_p[:B, :H]


def rnn_net_forward(inputs, hidden_state, params):
    """Single step, matching PyTorch RNNNet.forward: inputs (B, d_in)."""
    q_seq, h = rnn_net_rollout(inputs[None], hidden_state, params)
    return q_seq[0], h


# --------------------------------------------------------------------------
# Params + pure-JAX (f32) references
# --------------------------------------------------------------------------
def init_params(key, d_in, hidden, n_actions):
    ks = jax.random.split(key, 10)
    s = 0.1
    return {
        "w1": s * jax.random.normal(ks[0], (d_in, hidden), jnp.float32),
        "b1": s * jax.random.normal(ks[1], (1, hidden), jnp.float32),
        "w_ih": s * jax.random.normal(ks[2], (hidden, 3 * hidden), jnp.float32),
        "w_hh": s * jax.random.normal(ks[3], (hidden, 3 * hidden), jnp.float32),
        "b_ih": s * jax.random.normal(ks[4], (1, 3 * hidden), jnp.float32),
        "b_hh": s * jax.random.normal(ks[5], (1, 3 * hidden), jnp.float32),
        "w2": s * jax.random.normal(ks[6], (hidden, n_actions), jnp.float32),
        "b2": s * jax.random.normal(ks[7], (1, n_actions), jnp.float32),
    }


def rnn_net_forward_ref(inputs, hidden_state, params):
    H = params["w1"].shape[1]
    h_in = hidden_state.reshape(-1, H)
    x = jnp.maximum(inputs @ params["w1"] + params["b1"], 0.0)
    gi = x @ params["w_ih"] + params["b_ih"]
    gh = h_in @ params["w_hh"] + params["b_hh"]
    r = jax.nn.sigmoid(gi[:, :H] + gh[:, :H])
    z = jax.nn.sigmoid(gi[:, H:2 * H] + gh[:, H:2 * H])
    n = jnp.tanh(gi[:, 2 * H:] + r * gh[:, 2 * H:])
    h = (1.0 - z) * n + z * h_in
    q = h @ params["w2"] + params["b2"]
    return q, h


def rnn_net_rollout_ref(inputs_seq, hidden_state, params):
    H = params["w1"].shape[1]
    h = hidden_state.reshape(-1, H)
    qs = []
    for t in range(inputs_seq.shape[0]):
        q, h = rnn_net_forward_ref(inputs_seq[t], h, params)
        qs.append(q)
    return jnp.stack(qs), h


if __name__ == "__main__":
    B, D_IN, HIDDEN, N_ACTIONS, T = 4, 16, 32, 8, 8

    key = jax.random.PRNGKey(0)
    k_in, k_seq, k_h, k_p = jax.random.split(key, 4)

    inputs = jax.random.normal(k_in, (B, D_IN), jnp.float32)
    inputs_seq = jax.random.normal(k_seq, (T, B, D_IN), jnp.float32)
    hidden = jax.random.normal(k_h, (B, HIDDEN), jnp.float32)
    params = init_params(k_p, D_IN, HIDDEN, N_ACTIONS)

    # bf16 weights in the kernel vs f32 reference -> loosened tolerances.
    ATOL = RTOL = 2e-2

    # Single step (the PyTorch module's forward).
    q, h = rnn_net_forward(inputs, hidden, params)
    q = jax.block_until_ready(q)
    h = jax.block_until_ready(h)
    q_ref, h_ref = rnn_net_forward_ref(inputs, hidden, params)
    assert q.shape == (B, N_ACTIONS) and h.shape == (B, HIDDEN)
    assert jnp.allclose(q, q_ref, atol=ATOL, rtol=RTOL)
    assert jnp.allclose(h, h_ref, atol=ATOL, rtol=RTOL)

    # Fused T-step rollout: one pallas_call, one grid step for T<=16.
    q_seq, h_T = rnn_net_rollout(inputs_seq, hidden, params)
    q_seq = jax.block_until_ready(q_seq)
    h_T = jax.block_until_ready(h_T)
    q_seq_ref, h_T_ref = rnn_net_rollout_ref(inputs_seq, hidden, params)
    assert q_seq.shape == (T, B, N_ACTIONS) and h_T.shape == (B, HIDDEN)
    assert jnp.allclose(q_seq, q_seq_ref, atol=ATOL, rtol=RTOL)
    assert jnp.allclose(h_T, h_T_ref, atol=ATOL, rtol=RTOL)

    print("KERNEL_OK")
</pallas_src>

<mosaic_0001>
module attributes {stable_mosaic.version = 11 : i64} {
  func.func @rnn_chunk_kernel(%arg0: i32, %arg1: memref<1x8x16xf32, #tpu.memory_space<vmem>>, %arg2: memref<8x128xf32, #tpu.memory_space<vmem>>, %arg3: memref<16x128xbf16, #tpu.memory_space<vmem>>, %arg4: memref<1x128xf32, #tpu.memory_space<vmem>>, %arg5: memref<128x384xbf16, #tpu.memory_space<vmem>>, %arg6: memref<1x384xf32, #tpu.memory_space<vmem>>, %arg7: memref<128x384xbf16, #tpu.memory_space<vmem>>, %arg8: memref<1x128xf32, #tpu.memory_space<vmem>>, %arg9: memref<128x128xbf16, #tpu.memory_space<vmem>>, %arg10: memref<1x128xf32, #tpu.memory_space<vmem>>, %arg11: memref<1x8x128xf32, #tpu.memory_space<vmem>>, %arg12: memref<8x128xf32, #tpu.memory_space<vmem>>, %arg13: memref<1x8x384xf32, #tpu.memory_space<vmem>>, %arg14: memref<1x8x128xf32, #tpu.memory_space<vmem>>) attributes {dimension_semantics = [#tpu.dimension_semantics<arbitrary>], iteration_bounds = array<i64: 1>, scalar_prefetch = 0 : i64, scratch_operands = 2 : i64, tpu.core_type = #tpu.core_type<tc>, window_params = [{transform_indices = @transform_0, window_bounds = array<i64: 1, 8, 16>}, {pipeline_mode = #tpu.pipeline_mode<synchronous>, transform_indices = @transform_1, window_bounds = array<i64: 8, 128>}, {pipeline_mode = #tpu.pipeline_mode<synchronous>, transform_indices = @transform_2, window_bounds = array<i64: 16, 128>}, {pipeline_mode = #tpu.pipeline_mode<synchronous>, transform_indices = @transform_3, window_bounds = array<i64: 1, 128>}, {pipeline_mode = #tpu.pipeline_mode<synchronous>, transform_indices = @transform_4, window_bounds = array<i64: 128, 384>}, {pipeline_mode = #tpu.pipeline_mode<synchronous>, transform_indices = @transform_5, window_bounds = array<i64: 1, 384>}, {pipeline_mode = #tpu.pipeline_mode<synchronous>, transform_indices = @transform_6, window_bounds = array<i64: 128, 384>}, {pipeline_mode = #tpu.pipeline_mode<synchronous>, transform_indices = @transform_7, window_bounds = array<i64: 1, 128>}, {pipeline_mode = #tpu.pipeline_mode<synchronous>, transform_indices = @transform_8, window_bounds = array<i64: 128, 128>}, {pipeline_mode = #tpu.pipeline_mode<synchronous>, transform_indices = @transform_9, window_bounds = array<i64: 1, 128>}, {transform_indices = @transform_10, window_bounds = array<i64: 1, 8, 128>}, {pipeline_mode = #tpu.pipeline_mode<synchronous>, transform_indices = @transform_11, window_bounds = array<i64: 8, 128>}]} {
    %c0_i32 = arith.constant 0 : i32
    %0 = arith.cmpi eq, %arg0, %c0_i32 : i32
    %1 = arith.extui %0 : i1 to i32
    %c0_i32_0 = arith.constant 0 : i32
    %2 = arith.cmpi ne, %1, %c0_i32_0 : i32
    scf.if %2 {
      %c0_43 = arith.constant 0 : index
      %c0_44 = arith.constant 0 : index
      %66 = vector.load %arg2[%c0_43, %c0_44] : memref<8x128xf32, #tpu.memory_space<vmem>>, vector<8x128xf32>
      %c0_45 = arith.constant 0 : index
      %c0_46 = arith.constant 0 : index
      %67 = vector.load %arg12[%c0_45, %c0_46] : memref<8x128xf32, #tpu.memory_space<vmem>>, vector<8x128xf32>
      tpu.vector_store %arg12[%c0_45, %c0_46], %66 {strides = array<i32>} : memref<8x128xf32, #tpu.memory_space<vmem>>, vector<8x128xf32>,
    } else {
    }
    %c0 = arith.constant 0 : index
    %c0_1 = arith.constant 0 : index
    %c0_2 = arith.constant 0 : index
    %3 = vector.load %arg1[%c0, %c0_1, %c0_2] : memref<1x8x16xf32, #tpu.memory_space<vmem>>, vector<1x8x16xf32>
    %4 = vector.shape_cast %3 : vector<1x8x16xf32> to vector<8x16xf32>
    %5 = arith.truncf %4 : vector<8x16xf32> to vector<8x16xbf16>
    %c0_3 = arith.constant 0 : index
    %c0_4 = arith.constant 0 : index
    %6 = vector.load %arg3[%c0_3, %c0_4] : memref<16x128xbf16, #tpu.memory_space<vmem>>, vector<16x128xbf16>
    %cst = arith.constant dense<0.000000e+00> : vector<8x128xf32>
    %7 = tpu.matmul %5, %6, %cst {dimension_numbers = #tpu.dot_dimension_numbers<[1], [0], [0], [1], [0, 0, 1, 1], [], []>} : vector<8x16xbf16>, vector<16x128xbf16>, vector<8x128xf32> -> vector<8x128xf32>
    %c0_5 = arith.constant 0 : index
    %c0_6 = arith.constant 0 : index
    %8 = vector.load %arg4[%c0_5, %c0_6] : memref<1x128xf32, #tpu.memory_space<vmem>>, vector<1x128xf32>
    %9 = vector.broadcast %8 : vector<1x128xf32> to vector<8x128xf32>
    %10 = arith.addf %7, %9 : vector<8x128xf32>
    %cst_7 = arith.constant 0.000000e+00 : f32
    %11 = vector.broadcast %cst_7 : f32 to vector<8x128xf32>
    %12 = arith.maximumf %10, %11 : vector<8x128xf32>
    %13 = arith.truncf %12 : vector<8x128xf32> to vector<8x128xbf16>
    %c0_8 = arith.constant 0 : index
    %c0_9 = arith.constant 0 : index
    %14 = vector.load %arg5[%c0_8, %c0_9] : memref<128x384xbf16, #tpu.memory_space<vmem>>, vector<128x384xbf16>
    %cst_10 = arith.constant dense<0.000000e+00> : vector<8x384xf32>
    %15 = tpu.matmul %13, %14, %cst_10 {dimension_numbers = #tpu.dot_dimension_numbers<[1], [0], [0], [1], [0, 0, 1, 1], [], []>} : vector<8x128xbf16>, vector<128x384xbf16>, vector<8x384xf32> -> vector<8x384xf32>
    %c0_11 = arith.constant 0 : index
    %c0_12 = arith.constant 0 : index
    %16 = vector.load %arg6[%c0_11, %c0_12] : memref<1x384xf32, #tpu.memory_space<vmem>>, vector<1x384xf32>
    %17 = vector.broadcast %16 : vector<1x384xf32> to vector<8x384xf32>
    %18 = arith.addf %15, %17 : vector<8x384xf32>
    %19 = vector.shape_cast %18 : vector<8x384xf32> to vector<1x8x384xf32>
    %c0_13 = arith.constant 0 : index
    %c0_14 = arith.constant 0 : index
    %c0_15 = arith.constant 0 : index
    %20 = vector.load %arg13[%c0_13, %c0_14, %c0_15] : memref<1x8x384xf32, #tpu.memory_space<vmem>>, vector<1x8x384xf32>
    tpu.vector_store %arg13[%c0_13, %c0_14, %c0_15], %19 {strides = array<i32>} : memref<1x8x384xf32, #tpu.memory_space<vmem>>, vector<1x8x384xf32>,
    %c0_16 = arith.constant 0 : index
    %c0_17 = arith.constant 0 : index
    %21 = vector.load %arg12[%c0_16, %c0_17] : memref<8x128xf32, #tpu.memory_space<vmem>>, vector<8x128xf32>
    %c0_i32_18 = arith.constant 0 : i32
    %22 = arith.truncf %21 : vector<8x128xf32> to vector<8x128xbf16>
    %c0_19 = arith.constant 0 : index
    %c0_20 = arith.constant 0 : index
    %23 = vector.load %arg7[%c0_19, %c0_20] : memref<128x384xbf16, #tpu.memory_space<vmem>>, vector<128x384xbf16>
    %cst_21 = arith.constant dense<0.000000e+00> : vector<8x384xf32>
    %24 = tpu.matmul %22, %23, %cst_21 {dimension_numbers = #tpu.dot_dimension_numbers<[1], [0], [0], [1], [0, 0, 1, 1], [], []>} : vector<8x128xbf16>, vector<128x384xbf16>, vector<8x384xf32> -> vector<8x384xf32>
    %25 = arith.index_cast %c0_i32_18 : i32 to index
    %c0_22 = arith.constant 0 : index
    %c0_23 = arith.constant 0 : index
    %26 = vector.load %arg13[%25, %c0_22, %c0_23] : memref<1x8x384xf32, #tpu.memory_space<vmem>>, vector<1x8x384xf32>
    %27 = vector.shape_cast %26 : vector<1x8x384xf32> to vector<8x384xf32>
    %28 = vector.extract_strided_slice %27 {offsets = [0, 0], sizes = [8, 256], strides = [1, 1]} : vector<8x384xf32> to vector<8x256xf32>
    %29 = vector.extract_strided_slice %24 {offsets = [0, 0], sizes = [8, 256], strides = [1, 1]} : vector<8x384xf32> to vector<8x256xf32>
    %30 = arith.addf %28, %29 : vector<8x256xf32>
    %31 = arith.negf %30 : vector<8x256xf32>
    %32 = math.exp %31 : vector<8x256xf32>
    %cst_24 = arith.constant 1.000000e+00 : f32
    %33 = vector.broadcast %cst_24 : f32 to vector<8x256xf32>
    %34 = arith.addf %33, %32 : vector<8x256xf32>
    %35 = arith.divf %33, %34 : vector<8x256xf32>
    %36 = vector.extract_strided_slice %35 {offsets = [0, 0], sizes = [8, 128], strides = [1, 1]} : vector<8x256xf32> to vector<8x128xf32>
    %37 = vector.extract_strided_slice %35 {offsets = [0, 128], sizes = [8, 128], strides = [1, 1]} : vector<8x256xf32> to vector<8x128xf32>
    %38 = vector.extract_strided_slice %27 {offsets = [0, 256], sizes = [8, 128], strides = [1, 1]} : vector<8x384xf32> to vector<8x128xf32>
    %39 = vector.extract_strided_slice %24 {offsets = [0, 256], sizes = [8, 128], strides = [1, 1]} : vector<8x384xf32> to vector<8x128xf32>
    %c0_25 = arith.constant 0 : index
    %c0_26 = arith.constant 0 : index
    %40 = vector.load %arg8[%c0_25, %c0_26] : memref<1x128xf32, #tpu.memory_space<vmem>>, vector<1x128xf32>
    %41 = vector.broadcast %40 : vector<1x128xf32> to vector<8x128xf32>
    %42 = arith.addf %39, %41 : vector<8x128xf32>
    %43 = arith.mulf %36, %42 : vector<8x128xf32>
    %44 = arith.addf %38, %43 : vector<8x128xf32>
    %45 = math.tanh %44 : vector<8x128xf32>
    %cst_27 = arith.constant 1.000000e+00 : f32
    %46 = vector.broadcast %cst_27 : f32 to vector<8x128xf32>
    %47 = arith.subf %46, %37 : vector<8x128xf32>
    %48 = arith.mulf %47, %45 : vector<8x128xf32>
    %49 = arith.mulf %37, %21 : vector<8x128xf32>
    %50 = arith.addf %48, %49 : vector<8x128xf32>
    %51 = arith.index_cast %c0_i32_18 : i32 to index
    %c0_28 = arith.constant 0 : index
    %c0_29 = arith.constant 0 : index
    %52 = vector.load %arg14[%51, %c0_28, %c0_29] : memref<1x8x128xf32, #tpu.memory_space<vmem>>, vector<1x8x128xf32>
    %53 = vector.shape_cast %52 : vector<1x8x128xf32> to vector<8x128xf32>
    %54 = vector.shape_cast %50 : vector<8x128xf32> to vector<1x8x128xf32>
    tpu.vector_store %arg14[%51, %c0_28, %c0_29], %54 {strides = array<i32>} : memref<1x8x128xf32, #tpu.memory_space<vmem>>, vector<1x8x128xf32>,
    %c1_i32 = arith.constant 1 : i32
    %c0_30 = arith.constant 0 : index
    %c0_31 = arith.constant 0 : index
    %55 = vector.load %arg12[%c0_30, %c0_31] : memref<8x128xf32, #tpu.memory_space<vmem>>, vector<8x128xf32>
    tpu.vector_store %arg12[%c0_30, %c0_31], %50 {strides = array<i32>} : memref<8x128xf32, #tpu.memory_space<vmem>>, vector<8x128xf32>,
    %c0_32 = arith.constant 0 : index
    %c0_33 = arith.constant 0 : index
    %c0_34 = arith.constant 0 : index
    %56 = vector.load %arg14[%c0_32, %c0_33, %c0_34] : memref<1x8x128xf32, #tpu.memory_space<vmem>>, vector<1x8x128xf32>
    %57 = vector.shape_cast %56 : vector<1x8x128xf32> to vector<8x128xf32>
    %58 = arith.truncf %57 : vector<8x128xf32> to vector<8x128xbf16>
    %c0_35 = arith.constant 0 : index
    %c0_36 = arith.constant 0 : index
    %59 = vector.load %arg9[%c0_35, %c0_36] : memref<128x128xbf16, #tpu.memory_space<vmem>>, vector<128x128xbf16>
    %cst_37 = arith.constant dense<0.000000e+00> : vector<8x128xf32>
    %60 = tpu.matmul %58, %59, %cst_37 {dimension_numbers = #tpu.dot_dimension_numbers<[1], [0], [0], [1], [0, 0, 1, 1], [], []>} : vector<8x128xbf16>, vector<128x128xbf16>, vector<8x128xf32> -> vector<8x128xf32>
    %c0_38 = arith.constant 0 : index
    %c0_39 = arith.constant 0 : index
    %61 = vector.load %arg10[%c0_38, %c0_39] : memref<1x128xf32, #tpu.memory_space<vmem>>, vector<1x128xf32>
    %62 = vector.broadcast %61 : vector<1x128xf32> to vector<8x128xf32>
    %63 = arith.addf %60, %62 : vector<8x128xf32>
    %64 = vector.shape_cast %63 : vector<8x128xf32> to vector<1x8x128xf32>
    %c0_40 = arith.constant 0 : index
    %c0_41 = arith.constant 0 : index
    %c0_42 = arith.constant 0 : index
    %65 = vector.load %arg11[%c0_40, %c0_41, %c0_42] : memref<1x8x128xf32, #tpu.memory_space<vmem>>, vector<1x8x128xf32>
    tpu.vector_store %arg11[%c0_40, %c0_41, %c0_42], %64 {strides = array<i32>} : memref<1x8x128xf32, #tpu.memory_space<vmem>>, vector<1x8x128xf32>,
    return
  }
  func.func @transform_0(%arg0: i32) -> (i32, i32, i32) {
    %c0_i32 = arith.constant 0 : i32
    %c0_i32_0 = arith.constant 0 : i32
    %c0_i32_1 = arith.constant 0 : i32
    return %arg0, %c0_i32, %c0_i32_0 : i32, i32, i32
  }
  func.func @transform_1(%arg0: i32) -> (i32, i32) {
    %c0_i32 = arith.constant 0 : i32
    %c0_i32_0 = arith.constant 0 : i32
    %c0_i32_1 = arith.constant 0 : i32
    return %c0_i32, %c0_i32_0 : i32, i32
  }
  func.func @transform_2(%arg0: i32) -> (i32, i32) {
    %c0_i32 = arith.constant 0 : i32
    %c0_i32_0 = arith.constant 0 : i32
    %c0_i32_1 = arith.constant 0 : i32
    return %c0_i32, %c0_i32_0 : i32, i32
  }
  func.func @transform_3(%arg0: i32) -> (i32, i32) {
    %c0_i32 = arith.constant 0 : i32
    %c0_i32_0 = arith.constant 0 : i32
    %c0_i32_1 = arith.constant 0 : i32
    return %c0_i32, %c0_i32_0 : i32, i32
  }
  func.func @transform_4(%arg0: i32) -> (i32, i32) {
    %c0_i32 = arith.constant 0 : i32
    %c0_i32_0 = arith.constant 0 : i32
    %c0_i32_1 = arith.constant 0 : i32
    return %c0_i32, %c0_i32_0 : i32, i32
  }
  func.func @transform_5(%arg0: i32) -> (i32, i32) {
    %c0_i32 = arith.constant 0 : i32
    %c0_i32_0 = arith.constant 0 : i32
    %c0_i32_1 = arith.constant 0 : i32
    return %c0_i32, %c0_i32_0 : i32, i32
  }
  func.func @transform_6(%arg0: i32) -> (i32, i32) {
    %c0_i32 = arith.constant 0 : i32
    %c0_i32_0 = arith.constant 0 : i32
    %c0_i32_1 = arith.constant 0 : i32
    return %c0_i32, %c0_i32_0 : i32, i32
  }
  func.func @transform_7(%arg0: i32) -> (i32, i32) {
    %c0_i32 = arith.constant 0 : i32
    %c0_i32_0 = arith.constant 0 : i32
    %c0_i32_1 = arith.constant 0 : i32
    return %c0_i32, %c0_i32_0 : i32, i32
  }
  func.func @transform_8(%arg0: i32) -> (i32, i32) {
    %c0_i32 = arith.constant 0 : i32
    %c0_i32_0 = arith.constant 0 : i32
    %c0_i32_1 = arith.constant 0 : i32
    return %c0_i32, %c0_i32_0 : i32, i32
  }
  func.func @transform_9(%arg0: i32) -> (i32, i32) {
    %c0_i32 = arith.constant 0 : i32
    %c0_i32_0 = arith.constant 0 : i32
    %c0_i32_1 = arith.constant 0 : i32
    return %c0_i32, %c0_i32_0 : i32, i32
  }
  func.func @transform_10(%arg0: i32) -> (i32, i32, i32) {
    %c0_i32 = arith.constant 0 : i32
    %c0_i32_0 = arith.constant 0 : i32
    %c0_i32_1 = arith.constant 0 : i32
    return %arg0, %c0_i32, %c0_i32_0 : i32, i32, i32
  }
  func.func @transform_11(%arg0: i32) -> (i32, i32) {
    %c0_i32 = arith.constant 0 : i32
    %c0_i32_0 = arith.constant 0 : i32
    %c0_i32_1 = arith.constant 0 : i32
    return %c0_i32, %c0_i32_0 : i32, i32
  }
}

</mosaic_0001>

<bundles_post_ra>
// kernel: tpu_custom_call.1
= control target key start
LH: loop header
LB: loop body
LE: loop exit
PB: predicated region body
PF: predicated region fallthrough
CT: control target
= control target key end

     0   :  { %17 = vsyncpa [#allocation5], 0  ;;  %s1385_s0 = inlined_call_operand.vmem [shape: f32[1,8,16], index: 0, kind: input, shape index: {}]   ;;  %s1386_s1 = inlined_call_operand.hbm [shape: f32[8,128], index: 1, kind: input, shape index: {}, may-alias: {1,11}]   ;;  %s1387_s2 = inlined_call_operand.vmem [shape: bf16[16,128], index: 2, kind: input, shape index: {}]   ;;  %s1388_s3 = inlined_call_operand.vmem [shape: f32[1,128], index: 3, kind: input, shape index: {}]   ;;  %s1389_s4 = inlined_call_operand.hbm [shape: bf16[128,384], index: 4, kind: input, shape index: {}]   ;;  %s1390_s5 = inlined_call_operand.vmem [shape: f32[1,384], index: 5, kind: input, shape index: {}]   ;;  %s1391_s6 = inlined_call_operand.hbm [shape: bf16[128,384], index: 6, kind: input, shape index: {}]   ;;  %s1392_s7 = inlined_call_operand.hbm [shape: f32[1,128], index: 7, kind: input, shape index: {}]   ;;  %s1393_s8 = inlined_call_operand.hbm [shape: bf16[128,128], index: 8, kind: input, shape index: {}]   ;;  %s1394_s9 = inlined_call_operand.hbm [shape: f32[1,128], index: 9, kind: input, shape index: {}]   ;;  %s1395_s10 = inlined_call_operand.hbm [shape: f32[1,8,128], index: 10, kind: output, shape index: {0}]   ;;  %s1396_s11 = inlined_call_operand.hbm [shape: f32[8,128], index: 11, kind: output, shape index: {1}, may-alias: {1,11}]  }
   0x1   :  { %18 = vsyncpa [#allocation8], 0 }
   0x2   :  { %19 = vsyncpa [#allocation11], 0 }
   0x3   :  { %20 = vsyncpa [#allocation14], 0 }
   0x4   :  { %21 = vsyncpa [#allocation6], 0  ;;  %s44_s19 = sshll.u32 %s1389_s4, 4  ;;  %s45_s19 = int_to_ptr.hbm [resolvable:$true] %s44_s19 }
   0x5   :  { %22 = vsyncpa [#allocation17], 0  ;;  %s1272_s20 = smov [#allocation7]   ;;  %s73_s24 = sshll.u32 %s1392_s7, 4  ;;  %s74_s24 = int_to_ptr.hbm [resolvable:$true] %s73_s24 }
   0x6   :  { %s46_s21 = sshll.u32 %s1272_s20, 4  ;;  %s1273_s25 = smov 192   ;;  %s47_s21 = int_to_ptr.vmem [resolvable:$true] %s46_s21 }
   0x7   :  { %s1274_s26 = smov 12   ;;  %s1275_s27 = smov [#allocation10]  }
   0x8   :  { %52 = dma.hbm_to_vmem [thread:$0]  %s45_s19, 3072, %s47_s21, [#allocation8], %s1273_s25, %s1273_s25, %s1274_s26  }
   0x9   :  { %s75_s28 = sshll.u32 %s1275_s27, 4  ;;  %s30_s12 = sshll.u32 %s1386_s1, 4  ;;  %s76_s28 = int_to_ptr.vmem [resolvable:$true] %s75_s28  ;;  %s31_s12 = int_to_ptr.hbm [resolvable:$true] %s30_s12 }
   0xa   :  { %78 = dma.hbm_to_vmem [thread:$0]  %s74_s24, 16, %s76_s28, [#allocation11]  }
   0xb   :  { %s59_s14 = sshll.u32 %s1391_s6, 4  ;;  %s1276_s15 = smov [#allocation4]   ;;  %s60_s14 = int_to_ptr.hbm [resolvable:$true] %s59_s14 }
   0xc   :  { %s32_s16 = sshll.u32 %s1276_s15, 4  ;;  %s1277_s7 = smov [#allocation9]   ;;  %s33_s16 = int_to_ptr.vmem [resolvable:$true] %s32_s16 }
   0xd   :  { %35 = dma.hbm_to_vmem [thread:$0]  %s31_s12, 128, %s33_s16, [#allocation5]  }
   0xe   :  { %s61_s17 = sshll.u32 %s1277_s7, 4  ;;  %s83_s20 = sshll.u32 %s1393_s8, 4  ;;  %s62_s17 = int_to_ptr.vmem [resolvable:$true] %s61_s17  ;;  %s84_s20 = int_to_ptr.hbm [resolvable:$true] %s83_s20 }
   0xf   :  { %67 = dma.hbm_to_vmem [thread:$0]  %s60_s14, 3072, %s62_s17, [#allocation8], %s1273_s25, %s1273_s25, %s1274_s26  }
  0x10   :  { %s1278_s1 = smov [#allocation12]   ;;  %s97_s6 = sshll.u32 %s1394_s9, 4  ;;  %s98_s6 = int_to_ptr.hbm [resolvable:$true] %s97_s6 }
  0x11   :  { %s85_s21 = sshll.u32 %s1278_s1, 4  ;;  %s1279_s24 = smov 64   ;;  %s86_s21 = int_to_ptr.vmem [resolvable:$true] %s85_s21 }
  0x12   :  { %s1280_s27 = smov 4   ;;  %s1281_s28 = smov [#allocation13]  }
  0x13   :  { %91 = dma.hbm_to_vmem [thread:$0]  %s84_s20, 1024, %s86_s21, [#allocation11], %s1279_s24, %s1279_s24, %s1280_s27  }
  0x14   :  { %s99_s29 = sshll.u32 %s1281_s28, 4  ;;  %s100_s29 = int_to_ptr.vmem [resolvable:$true] %s99_s29 }
  0x15   :  { %102 = dma.hbm_to_vmem [thread:$0]  %s98_s6, 16, %s100_s29, [#allocation14]  }
  0x16   :  { %1260 = dma.done.wait [#allocation5], 128  }
  0x17   :  { %1261 = vsyncadd [#allocation5], 4294967168 }
  0x18   :  { %1262 = dma.done.wait [#allocation8], 6144  }
  0x19   :  { %1263 = vsyncadd [#allocation8], 4294961152 }
  0x1a   :  { %1264 = dma.done.wait [#allocation11], 1040  }
  0x1b   :  { %1265 = vsyncadd [#allocation11], 4294966256 }
  0x1c   :  { %1266 = dma.done.wait [#allocation14], 16  }
  0x1d   :  { %1267 = vsyncadd [#allocation14], 4294967280  ;;  %v986_v0 = vld [vmem:[%s1387_s2] sm:$0xff]  ;;  %v846_v2 = vld [vmem:[#allocation7 + $0xa8] sm:$0xf]  ;;  %vm148_vm0 = vcmask 130048  }
  0x1e   :  { %v134_v1 = vld [vmem:[%s1385_s0] sm:$0xff]  ;;  %v1009_v4 = vld [vmem:[#allocation7 + $0xb0] sm:$0xf0]  ;;  %v834_v5 = vld [vmem:[#allocation7 + $0x90] sm:$0xf]  ;;  %159 = vmatpush.bf16.msra.mxu0 %v986_v0  ;;  %s737_s14 = sshll.u32 %s1396_s11, 4  ;;  %s738_s14 = int_to_ptr.hbm [resolvable:$true] %s737_s14 }
  0x1f   :  { %v135_v3 = vpack.c.bf16 %v134_v1, %v134_v1  ;;  %v1006_v6 = vld [vmem:[#allocation7 + $0x98] sm:$0xf0]  ;;  %v847_v7 = vor.u32 %v1009_v4, %v846_v2  ;;  %v1008_v8 = vld [vmem:[#allocation7 + $0xac] sm:$0xf]  ;;  %v848_v9 = vld [vmem:[#allocation7 + $0xb4] sm:$0xf0] }
  0x20   :  { %v851_v10 = vor.u32 %v1008_v8, %v848_v9  ;;  %v1005_v11 = vld [vmem:[#allocation7 + $0x94] sm:$0xf]  ;;  %v836_v12 = vld [vmem:[#allocation7 + $0x9c] sm:$0xf0]  ;;  %v835_v13 = vor.u32 %v1006_v6, %v834_v5  ;;  %v822_v14 = vld [vmem:[#allocation7 + $0x78] sm:$0xf] }
  0x21   :  { %335 = vmatpush.bf16.msra.mxu1 %v847_v7  ;;  %v942_v15 = vld [vmem:[#allocation9 + $0xa8] sm:$0xf]  ;;  %759 = vmatmul.msk.bf16.vlgmr.msra.gmra.mxu0 %vm148_vm0, %v135_v3  ;;  %v1003_v16 = vld [vmem:[#allocation7 + $0x80] sm:$0xf0]  ;;  %v839_v17 = vor.u32 %v1005_v11, %v836_v12  ;;  %v1033_v18 = vld [vmem:[#allocation9 + $0xb0] sm:$0xf0] }
  0x22   :  { %348 = vmatpush.bf16.msra.mxu2 %v851_v10  ;;  %v1002_v19 = vld [vmem:[#allocation7 + $0x7c] sm:$0xf]  ;;  %v943_v20 = vor.u32 %v1033_v18, %v942_v15  ;;  %v824_v21 = vld [vmem:[#allocation7 + $0x84] sm:$0xf0]  ;;  %v854_v22 = vld [vmem:[#allocation7 + $0xb0] sm:$0xf]  ;;  %v823_v27 = vor.u32 %v1003_v16, %v822_v14 }
  0x23   :  { %v1010_v23 = vld [vmem:[#allocation7 + $0xb8] sm:$0xf0]  ;;  %v930_v25 = vld [vmem:[#allocation9 + $0x90] sm:$0xf]  ;;  %v810_v28 = vld [vmem:[#allocation7 + $0x60] sm:$0xf]  ;;  %v827_v32 = vor.u32 %v1002_v19, %v824_v21 }
  0x24   :  { %v855_v24 = vor.u32 %v1010_v23, %v854_v22  ;;  %v1030_v26 = vld [vmem:[#allocation9 + $0x98] sm:$0xf0]  ;;  %539 = vmatpush.bf16.msrb.mxu0 %v943_v20  ;;  %v842_v30 = vld [vmem:[#allocation7 + $0x98] sm:$0xf]  ;;  %v1000_v31 = vld [vmem:[#allocation7 + $0x68] sm:$0xf0] }
  0x25   :  { %336 = vmatpush.bf16.msra.mxu1 %v835_v13  ;;  %v931_v29 = vor.u32 %v1030_v26, %v930_v25  ;;  %v999_v33 = vld [vmem:[#allocation7 + $0x64] sm:$0xf]  ;;  %v812_v35 = vld [vmem:[#allocation7 + $0x6c] sm:$0xf0]  ;;  %v918_v37 = vld [vmem:[#allocation9 + $0x78] sm:$0xf]  ;;  %v811_v41 = vor.u32 %v1000_v31, %v810_v28 }
  0x26   :  { %349 = vmatpush.bf16.msra.mxu2 %v839_v17  ;;  %361 = vmatpush.bf16.msra.mxu3 %v855_v24  ;;  %v1007_v34 = vld [vmem:[#allocation7 + $0xa0] sm:$0xf0]  ;;  %v830_v39 = vld [vmem:[#allocation7 + $0x80] sm:$0xf]  ;;  %v1004_v40 = vld [vmem:[#allocation7 + $0x88] sm:$0xf0]  ;;  %v815_v45 = vor.u32 %v999_v33, %v812_v35 }
  0x27   :  { %v843_v36 = vor.u32 %v1007_v34, %v842_v30  ;;  %v1027_v38 = vld [vmem:[#allocation9 + $0x80] sm:$0xf0]  ;;  %v798_v42 = vld [vmem:[#allocation7 + $0x48] sm:$0xf]  ;;  %v997_v43 = vld [vmem:[#allocation7 + $0x50] sm:$0xf0]  ;;  %v831_v47 = vor.u32 %v1004_v40, %v830_v39 }
  0x28   :  { %540 = vmatpush.bf16.msrb.mxu0 %v931_v29  ;;  %v919_v44 = vor.u32 %v1027_v38, %v918_v37  ;;  %v996_v46 = vld [vmem:[#allocation7 + $0x4c] sm:$0xf]  ;;  %v906_v48 = vld [vmem:[#allocation9 + $0x60] sm:$0xf]  ;;  %v800_v50 = vld [vmem:[#allocation7 + $0x54] sm:$0xf0]  ;;  %v799_v53 = vor.u32 %v997_v43, %v798_v42 }
  0x29   :  { %337 = vmatpush.bf16.msra.mxu1 %v823_v27  ;;  %v1024_v49 = vld [vmem:[#allocation9 + $0x68] sm:$0xf0]  ;;  %v818_v51 = vld [vmem:[#allocation7 + $0x68] sm:$0xf]  ;;  %v1001_v52 = vld [vmem:[#allocation7 + $0x70] sm:$0xf0]  ;;  %v803_v57 = vor.u32 %v996_v46, %v800_v50 }
  0x2a   :  { %350 = vmatpush.bf16.msra.mxu2 %v827_v32  ;;  %362 = vmatpush.bf16.msra.mxu3 %v843_v36  ;;  %v786_v54 = vld [vmem:[#allocation7 + $0x30] sm:$0xf]  ;;  %v994_v55 = vld [vmem:[#allocation7 + $0x38] sm:$0xf0]  ;;  %v907_v56 = vor.u32 %v1024_v49, %v906_v48  ;;  %v993_v58 = vld [vmem:[#allocation7 + $0x34] sm:$0xf]  ;;  %v819_v59 = vor.u32 %v1001_v52, %v818_v51 }
  0x2b   :  { %v894_v60 = vld [vmem:[#allocation9 + $0x48] sm:$0xf]  ;;  %v1021_v61 = vld [vmem:[#allocation9 + $0x50] sm:$0xf0]  ;;  %v788_v62 = vld [vmem:[#allocation7 + $0x3c] sm:$0xf0]  ;;  %v787_v2 = vor.u32 %v994_v55, %v786_v54 }
  0x2c   :  { %541 = vmatpush.bf16.msrb.mxu0 %v919_v44  ;;  %v806_v63 = vld [vmem:[#allocation7 + $0x50] sm:$0xf]  ;;  %v998_v0 = vld [vmem:[#allocation7 + $0x58] sm:$0xf0]  ;;  %v774_v1 = vld [vmem:[#allocation7 + $0x18] sm:$0xf]  ;;  %v895_v4 = vor.u32 %v1021_v61, %v894_v60  ;;  %v791_v7 = vor.u32 %v993_v58, %v788_v62 }
  0x2d   :  { %338 = vmatpush.bf16.msra.mxu1 %v811_v41  ;;  %v991_v3 = vld [vmem:[#allocation7 + $0x20] sm:$0xf0]  ;;  %v990_v5 = vld [vmem:[#allocation7 + $0x1c] sm:$0xf]  ;;  %v776_v6 = vld [vmem:[#allocation7 + $0x24] sm:$0xf0]  ;;  %v807_v8 = vor.u32 %v998_v0, %v806_v63 }
  0x2e   :  { %351 = vmatpush.bf16.msra.mxu2 %v815_v45  ;;  %363 = vmatpush.bf16.msra.mxu3 %v831_v47  ;;  %v882_v9 = vld [vmem:[#allocation9 + $0x30] sm:$0xf]  ;;  %v1018_v10 = vld [vmem:[#allocation9 + $0x38] sm:$0xf0]  ;;  %v794_v11 = vld [vmem:[#allocation7 + $0x38] sm:$0xf]  ;;  %v775_v13 = vor.u32 %v991_v3, %v774_v1  ;;  %v779_v17 = vor.u32 %v990_v5, %v776_v6 }
  0x2f   :  { %v995_v12 = vld [vmem:[#allocation7 + $0x40] sm:$0xf0]  ;;  %v762_v14 = vld [vmem:[#allocation7] sm:$0xf]  ;;  %v988_v15 = vld [vmem:[#allocation7 + $0x8] sm:$0xf0]  ;;  %v883_v16 = vor.u32 %v1018_v10, %v882_v9 }
  0x30   :  { %542 = vmatpush.bf16.msrb.mxu0 %v907_v56  ;;  %v1032_v18 = vld [vmem:[#allocation9 + $0xac] sm:$0xf]  ;;  %v795_v19 = vor.u32 %v995_v12, %v794_v11  ;;  %v870_v20 = vld [vmem:[#allocation9 + $0x18] sm:$0xf]  ;;  %v1015_v21 = vld [vmem:[#allocation9 + $0x20] sm:$0xf0]  ;;  %v763_v27 = vor.u32 %v988_v15, %v762_v14 }
  0x31   :  { %339 = vmatpush.bf16.msra.mxu1 %v799_v53  ;;  %v944_v22 = vld [vmem:[#allocation9 + $0xb4] sm:$0xf0]  ;;  %v987_v23 = vld [vmem:[#allocation7 + $0x4] sm:$0xf]  ;;  %v764_v24 = vld [vmem:[#allocation7 + $0xc] sm:$0xf0]  ;;  %v871_v28 = vor.u32 %v1015_v21, %v870_v20 }
  0x32   :  { %352 = vmatpush.bf16.msra.mxu2 %v803_v57  ;;  %364 = vmatpush.bf16.msra.mxu3 %v819_v59  ;;  %v950_v25 = vld [vmem:[#allocation9 + $0xb0] sm:$0xf]  ;;  %v1034_v26 = vld [vmem:[#allocation9 + $0xb8] sm:$0xf0]  ;;  %v947_v29 = vor.u32 %v1032_v18, %v944_v22  ;;  %v767_v30 = vor.u32 %v987_v23, %v764_v24  ;;  %v1029_v31 = vld [vmem:[#allocation9 + $0x94] sm:$0xf] }
  0x33   :  { %v932_v32 = vld [vmem:[#allocation9 + $0x9c] sm:$0xf0]  ;;  %v951_v33 = vor.u32 %v1034_v26, %v950_v25  ;;  %v992_v36 = vld [vmem:[#allocation7 + $0x28] sm:$0xf0]  ;;  %v1026_v37 = vld [vmem:[#allocation9 + $0x7c] sm:$0xf] }
  0x34   :  { %543 = vmatpush.bf16.msrb.mxu0 %v895_v4  ;;  %v935_v34 = vor.u32 %v1029_v31, %v932_v32  ;;  %v782_v35 = vld [vmem:[#allocation7 + $0x20] sm:$0xf]  ;;  %v920_v39 = vld [vmem:[#allocation9 + $0x84] sm:$0xf0]  ;;  %v938_v40 = vld [vmem:[#allocation9 + $0x98] sm:$0xf] }
  0x35   :  { %340 = vmatpush.bf16.msra.mxu1 %v787_v2  ;;  %v783_v38 = vor.u32 %v992_v36, %v782_v35  ;;  %v1031_v41 = vld [vmem:[#allocation9 + $0xa0] sm:$0xf0]  ;;  %v923_v42 = vor.u32 %v1026_v37, %v920_v39  ;;  %v858_v44 = vld [vmem:[#allocation9] sm:$0xf]  ;;  %v1012_v45 = vld [vmem:[#allocation9 + $0x8] sm:$0xf0] }
  0x36   :  { %353 = vmatpush.bf16.msra.mxu2 %v791_v7  ;;  %365 = vmatpush.bf16.msra.mxu3 %v807_v8  ;;  %v939_v43 = vor.u32 %v1031_v41, %v938_v40  ;;  %v859_v46 = vor.u32 %v1012_v45, %v858_v44  ;;  %v770_v47 = vld [vmem:[#allocation7 + $0x8] sm:$0xf]  ;;  %v989_v48 = vld [vmem:[#allocation7 + $0x10] sm:$0xf0]  ;;  %v1023_v49 = vld [vmem:[#allocation9 + $0x64] sm:$0xf] }
  0x37   :  { %v771_v50 = vor.u32 %v989_v48, %v770_v47  ;;  %v908_v51 = vld [vmem:[#allocation9 + $0x6c] sm:$0xf0]  ;;  %v926_v52 = vld [vmem:[#allocation9 + $0x80] sm:$0xf]  ;;  %v1028_v53 = vld [vmem:[#allocation9 + $0x88] sm:$0xf0] }
  0x38   :  { %544 = vmatpush.bf16.msrb.mxu0 %v883_v16  ;;  %v911_v54 = vor.u32 %v1023_v49, %v908_v51  ;;  %v927_v55 = vor.u32 %v1028_v53, %v926_v52  ;;  %v1368_v56 = vld [vmem:[#allocation4] sm:$0xff]  ;;  %v1020_v58 = vld [vmem:[#allocation9 + $0x4c] sm:$0xf]  ;;  %v914_v61 = vld [vmem:[#allocation9 + $0x68] sm:$0xf]  ;;  %s1283_s15 = smov [#allocation15]  }
  0x39   :  { %341 = vmatpush.bf16.msra.mxu1 %v775_v13  ;;  %v378_v57 = vpack.c.bf16 %v1368_v56, %v1368_v56  ;;  %v896_v59 = vld [vmem:[#allocation9 + $0x54] sm:$0xf0]  ;;  %v1025_v62 = vld [vmem:[#allocation9 + $0x70] sm:$0xf0]  ;;  %v884_v1 = vld [vmem:[#allocation9 + $0x3c] sm:$0xf0] }
  0x3a   :  { %354 = vmatpush.bf16.msra.mxu2 %v779_v17  ;;  %366 = vmatpush.bf16.msra.mxu3 %v795_v19  ;;  %v899_v60 = vor.u32 %v1020_v58, %v896_v59  ;;  %v915_v63 = vor.u32 %v1025_v62, %v914_v61  ;;  %v1017_v0 = vld [vmem:[#allocation9 + $0x34] sm:$0xf]  ;;  %v902_v2 = vld [vmem:[#allocation9 + $0x50] sm:$0xf]  ;;  %v1022_v4 = vld [vmem:[#allocation9 + $0x58] sm:$0xf0] }
  0x3b   :  { %v887_v3 = vor.u32 %v1017_v0, %v884_v1  ;;  %v903_v5 = vor.u32 %v1022_v4, %v902_v2  ;;  %v1014_v6 = vld [vmem:[#allocation9 + $0x1c] sm:$0xf]  ;;  %v872_v7 = vld [vmem:[#allocation9 + $0x24] sm:$0xf0]  ;;  %v890_v8 = vld [vmem:[#allocation9 + $0x38] sm:$0xf] }
  0x3c   :  { %545 = vmatpush.bf16.msrb.mxu0 %v871_v28  ;;  %v1019_v9 = vld [vmem:[#allocation9 + $0x40] sm:$0xf0]  ;;  %v875_v10 = vor.u32 %v1014_v6, %v872_v7  ;;  %v860_v13 = vld [vmem:[#allocation9 + $0xc] sm:$0xf0]  ;;  %v878_v14 = vld [vmem:[#allocation9 + $0x20] sm:$0xf] }
  0x3d   :  { %342 = vmatpush.bf16.msra.mxu1 %v763_v27  ;;  %v891_v11 = vor.u32 %v1019_v9, %v890_v8  ;;  %v1011_v12 = vld [vmem:[#allocation9 + $0x4] sm:$0xf]  ;;  %v1016_v15 = vld [vmem:[#allocation9 + $0x28] sm:$0xf0]  ;;  %v866_v18 = vld [vmem:[#allocation9 + $0x8] sm:$0xf] }
  0x3e   :  { %355 = vmatpush.bf16.msra.mxu2 %v767_v30  ;;  %367 = vmatpush.bf16.msra.mxu3 %v783_v38  ;;  %v863_v16 = vor.u32 %v1011_v12, %v860_v13  ;;  %v879_v17 = vor.u32 %v1016_v15, %v878_v14  ;;  %v1013_v19 = vld [vmem:[#allocation9 + $0x10] sm:$0xf0]  ;;  %v1055_v21 = vld [vmem:[%s1388_s3] ss:$0 sm:$0xff]  ;;  %v1039_v37 = vld [vmem:[#allocation12 + $0x20] sm:$0xff]  ;;  %s1282_s3 = smov [#allocation16]  }
  0x3f   :  { %v867_v20 = vor.u32 %v1013_v19, %v866_v18  ;;  %v199_v30 = vld [vmem:[%s1390_s5] sm:$0x7]  ;;  %v1035_v53 = vld [vmem:[#allocation12] sm:$0xff]  ;;  %v1056_v62 = vld [vmem:[#allocation10] ss:$0 sm:$0xff]  ;;  %s735_s5 = sshll.u32 %s1282_s3, 4  ;;  %s736_s5 = int_to_ptr.vmem [resolvable:$true] %s735_s5 }
  0x40   :  { %546 = vmatpush.bf16.msrb.mxu0 %v859_v46  ;;  %v1041_v31 = vld [vmem:[#allocation12 + $0x30] sm:$0xff]  ;;  %v201_v32 = vperm.slane %v199_v30, 0  ;;  %v1038_v41 = vld [vmem:[#allocation12 + $0x18] sm:$0xff]  ;;  %v202_v44 = vperm.slane %v199_v30, 1  ;;  %v1036_v46 = vld [vmem:[#allocation12 + $0x8] sm:$0xff]  ;;  %v203_v8 = vperm.slane %v199_v30, 2 }
  0x41   :  { %552 = vmatpush.bf16.msrb.mxu1 %v947_v29  ;;  %v1042_v29 = vld [vmem:[#allocation12 + $0x38] sm:$0xff]  ;;  %s724_s16 = sshll.u32 %s1283_s15, 4  ;;  %s726_s18 = sshll.u32 %s1395_s10, 4  ;;  %s725_s16 = int_to_ptr.vmem [resolvable:$true] %s724_s16  ;;  %s727_s18 = int_to_ptr.hbm [resolvable:$true] %s726_s18 }
  0x42   :  { %565 = vmatpush.bf16.msrb.mxu2 %v951_v33  ;;  %368 = vmatpush.bf16.msra.mxu3 %v771_v50  ;;  %v1040_v33 = vld [vmem:[#allocation12 + $0x28] sm:$0xff] }
  0x43   :  { %547 = vmatmul.bf16.vlgmr.msrb.gmra.mxu0 %v378_v57 }
  0x45   :  { %553 = vmatpush.bf16.msrb.mxu1 %v935_v34 }
  0x46   :  { %566 = vmatpush.bf16.msrb.mxu2 %v939_v43  ;;  %705 = vmatpush.bf16.msrb.mxu3 %v1042_v29  ;;  %v1037_v43 = vld [vmem:[#allocation12 + $0x10] sm:$0xff]  ;;  %v1057_v29 = vld [vmem:[#allocation13] ss:$0 sm:$0xff] }
  0x49   :  { %554 = vmatpush.bf16.msrb.mxu1 %v923_v42 }
  0x4a   :  { %567 = vmatpush.bf16.msrb.mxu2 %v927_v55  ;;  %706 = vmatpush.bf16.msrb.mxu3 %v1041_v31 }
  0x4d   :  { %555 = vmatpush.bf16.msrb.mxu1 %v911_v54 }
  0x4e   :  { %568 = vmatpush.bf16.msrb.mxu2 %v915_v63  ;;  %707 = vmatpush.bf16.msrb.mxu3 %v1040_v33 }
  0x51   :  { %556 = vmatpush.bf16.msrb.mxu1 %v899_v60 }
  0x52   :  { %569 = vmatpush.bf16.msrb.mxu2 %v903_v5  ;;  %708 = vmatpush.bf16.msrb.mxu3 %v1039_v37 }
  0x55   :  { %557 = vmatpush.bf16.msrb.mxu1 %v887_v3 }
  0x56   :  { %570 = vmatpush.bf16.msrb.mxu2 %v891_v11  ;;  %709 = vmatpush.bf16.msrb.mxu3 %v1038_v41 }
  0x59   :  { %558 = vmatpush.bf16.msrb.mxu1 %v875_v10 }
  0x5a   :  { %571 = vmatpush.bf16.msrb.mxu2 %v879_v17  ;;  %710 = vmatpush.bf16.msrb.mxu3 %v1037_v43 }
  0x5d   :  { %559 = vmatpush.bf16.msrb.mxu1 %v863_v16 }
  0x5e   :  { %572 = vmatpush.bf16.msrb.mxu2 %v867_v20  ;;  %711 = vmatpush.bf16.msrb.mxu3 %v1036_v46 }
  0x62   :  { %712 = vmatpush.bf16.msrb.mxu3 %v1035_v53 }
  0x9e   :  { %v161_v22 = vpop.f32.mrf.mxu0 }
  0x9f   :  { %v162_v23 = vadd.f32 %v1055_v21, %v161_v22 }
  0xa1   :  { %v165_v24 = vmax.f32 %v162_v23, 0.0 }
  0xa3   :  { %v166_v25 = vpack.c.bf16 %v165_v24, %v165_v24 }
  0xa5   :  { %343 = vmatmul.bf16.vlgmr.msra.gmra.mxu1 %v166_v25  ;;  %356 = vmatmul.bf16.vlgmr.msra.gmra.mxu2 %v166_v25 }
  0xa6   :  { %369 = vmatmul.bf16.vlgmr.msra.gmra.mxu3 %v166_v25  ;;  %v163_v26 = vpop.f32.mrf.mxu0 }
  0xb5   :  { %560 = vmatmul.bf16.vlgmr.msrb.gmra.mxu1 %v378_v57  ;;  %573 = vmatmul.bf16.vlgmr.msrb.gmra.mxu2 %v378_v57 }
  0xc0   :  { %v548_v27 = vpop.f32.mrf.mxu0 }
  0xc8   :  { %v550_v28 = vpop.f32.mrf.mxu0 }
 0x122   :  { %v344_v34 = vpop.f32.mrf.mxu1 }
 0x123   :  { %v345_v35 = vadd.f32 %v344_v34, %v201_v32 }
 0x125   :  { %v581_v36 = vadd.f32 %v548_v27, %v345_v35 }
 0x127   :  { %v952_v38 = vmul.f32 -1.442695, %v581_v36 }
 0x128   :  { %v357_v39 = vpop.f32.mrf.mxu2 }
 0x129   :  { %1058 = vpow2.f32 %v952_v38  ;;  %v370_v40 = vpop.f32.mrf.mxu3  ;;  %v358_v49 = vadd.f32 %v357_v39, %v202_v44 }
 0x12a   :  { %v346_v42 = vpop.f32.mrf.mxu1  ;;  %v371_v12 = vadd.f32 %v370_v40, %v203_v8 }
 0x12f   :  { %v1059_v45 = vpop.eup %1058 }
 0x130   :  { %v589_v47 = vadd.f32 1.0, %v1059_v45  ;;  %v359_v48 = vpop.f32.mrf.mxu2 }
 0x131   :  { %v372_v50 = vpop.f32.mrf.mxu3 }
 0x132   :  { %1060 = vrcp.f32 %v589_v47  ;;  %v561_v51 = vpop.f32.mrf.mxu1  ;;  %v602_v61 = vand.u32 2147483648, %v589_v47  ;;  %v600_v1 = vand.u32 2147483647, %v589_v47  ;;  %vm596_vm2 = vweird.f32 %v589_v47 }
 0x133   :  { %v582_v52 = vadd.f32 %v561_v51, %v358_v49 }
 0x134   :  { %v603_v4 = vor.u32 1.1754944e-38, %v602_v61  ;;  %vm601_vm4 = vcmp.eq.f32.partialorder %v600_v1, 8.507059e+37 }
 0x135   :  { %v953_v54 = vmul.f32 -1.442695, %v582_v52 }
 0x137   :  { %1062 = vpow2.f32 %v953_v54 }
 0x138   :  { %v1061_v55 = vpop.eup %1060  ;;  %v574_v57 = vpop.f32.mrf.mxu2 }
 0x139   :  { %v592_v58 = vmul.f32 %v1061_v55, %v589_v47  ;;  %vm597_vm1 = vweird.f32 %v1061_v55  ;;  %v625_v5 = vadd.f32 %v1056_v62, %v574_v57 }
 0x13a   :  { %v563_v59 = vpop.f32.mrf.mxu1  ;;  %vm598_vm3 = vmor %vm596_vm2, %vm597_vm1 }
 0x13b   :  { %v593_v60 = vsub.f32 1.0, %v592_v58 }
 0x13d   :  { %v1063_v63 = vpop.eup %1062  ;;  %v594_v0 = vmul.f32 %v1061_v55, %v593_v60 }
 0x13e   :  { %v590_v2 = vadd.f32 1.0, %v1063_v63 }
 0x13f   :  { %v595_v3 = vadd.f32 %v1061_v55, %v594_v0 }
 0x140   :  { %1064 = vrcp.f32 %v590_v2  ;;  %v576_v6 = vpop.f32.mrf.mxu2  ;;  %v617_v16 = vand.u32 2147483648, %v590_v2  ;;  %v615_v18 = vand.u32 2147483647, %v590_v2  ;;  %vm611_vm6 = vweird.f32 %v590_v2 }
 0x141   :  { %v599_v7 = vsel %vm598_vm3, %v1061_v55, %v595_v3 }
 0x142   :  { %v604_v9 = vsel %vm601_vm4, %v603_v4, %v599_v7  ;;  %v618_v20 = vor.u32 1.1754944e-38, %v617_v16  ;;  %vm616_vm8 = vcmp.eq.f32.partialorder %v615_v18, 8.507059e+37 }
 0x143   :  { %v626_v10 = vmul.f32 %v625_v5, %v604_v9 }
 0x145   :  { %v627_v14 = vadd.f32 %v626_v10, %v371_v12 }
 0x146   :  { %v1065_v11 = vpop.eup %1064 }
 0x147   :  { %v607_v13 = vmul.f32 %v1065_v11, %v590_v2  ;;  %vm612_vm5 = vweird.f32 %v1065_v11  ;;  %1066 = vtanh.f32 %v627_v14 }
 0x148   :  { %vm613_vm7 = vmor %vm611_vm6, %vm612_vm5 }
 0x149   :  { %v608_v15 = vsub.f32 1.0, %v607_v13 }
 0x14b   :  { %v609_v17 = vmul.f32 %v1065_v11, %v608_v15 }
 0x14d   :  { %v610_v19 = vadd.f32 %v1065_v11, %v609_v17  ;;  %v1067_v24 = vpop.eup %1066 }
 0x14f   :  { %v614_v21 = vsel %vm613_vm7, %v1065_v11, %v610_v19 }
 0x150   :  { %v619_v22 = vsel %vm616_vm8, %v618_v20, %v614_v21 }
 0x151   :  { %v629_v23 = vsub.f32 1.0, %v619_v22  ;;  %v631_v26 = vmul.f32 %v619_v22, %v1368_v56 }
 0x153   :  { %v630_v25 = vmul.f32 %v1067_v24, %v629_v23 }
 0x155   :  { %v632_v27 = vadd.f32 %v631_v26, %v630_v25 }
 0x157   :  { %v636_v28 = vpack.c.bf16 %v632_v27, %v632_v27  ;;  %634 = vst [vmem:[#allocation16] sm:$0xff] %v632_v27 }
 0x158   :  { %740 = dma.vmem_to_hbm [thread:$0]  %s736_s5, 128, %s738_s14, [#allocation17]  }
 0x159   :  { %713 = vmatmul.bf16.vlgmr.msrb.gmra.mxu3 %v636_v28 }
 0x1dc   :  { %v714_v56 = vpop.f32.mrf.mxu3 }
 0x1dd   :  { %v715_v30 = vadd.f32 %v1057_v29, %v714_v56 }
 0x1df   :  { %718 = vst [vmem:[#allocation15] sm:$0xff] %v715_v30 }
 0x1e0   :  { %729 = dma.vmem_to_hbm [thread:$0]  %s725_s16, 128, %s727_s18, [#allocation6]  }
 0x1e4   :  { %v716_v31 = vpop.f32.mrf.mxu3 }
 0x1e5   :  { %1268 = dma.done.wait [#allocation6], 128  }
 0x1e6   :  { %1269 = vsyncadd [#allocation6], 4294967168 }
 0x1e7   :  { %1270 = dma.done.wait [#allocation17], 128  }
 0x1e8   :  { %1271 = vsyncadd [#allocation17], 4294967168 }
 0x1e9   :  { %749 = vsyncpa [#allocation5], 1 }
 0x1ea   :  { %750 = vsyncpa [#allocation8], 1 }
 0x1eb   :  { %751 = vsyncpa [#allocation11], 1 }
 0x1ec   :  { %752 = vsyncpa [#allocation14], 1 }
 0x1ed   :  { %753 = vsyncpa [#allocation6], 1 }
 0x1ee   :  { %754 = vsyncpa [#allocation17], 1 }

</bundles_post_ra>
